<compile_context>
chip_gen: v5e
topology: v5e:2x2
jax: 0.10.0
libtpu: 0.0.40
codegen_flags: <defaults>
</compile_context>

<pallas_src>
import functools

import jax
import jax.numpy as jnp
from jax.experimental import pallas as pl
from jax.experimental.pallas import tpu as pltpu


def _round_up(x, m):
    return ((x + m - 1) // m) * m


def _chamfer_kernel(xa_ref, ya_ref, d1_ref, d2_ref, acc1_ref, *, tm, slab):
    # xa_ref:  (1, TN, 8)      augmented x tile (resident across j)
    # ya_ref:  (1, 8, TM)      augmented y tile (point axis lane-dense)
    # d1_ref:  (1, 1, TN)      lane-dense dist1 block (written at j == last)
    # d2_ref:  (1, 1, 1, Mp)   per-(b, i) resident dist2 partial accumulator
    # acc1_ref:(TN, slab)      VMEM scratch: running lane-slab min for dist1
    j = pl.program_id(2)
    nj = pl.num_programs(2)

    # Reset the per-(b, i) accumulators at the start of the j (M-tile) loop.
    @pl.when(j == 0)
    def _():
        acc1_ref[...] = jnp.full(acc1_ref.shape, jnp.inf, jnp.float32)
        d2_ref[...] = jnp.full(d2_ref.shape, jnp.inf, jnp.float32)

    xa = xa_ref[0]                         # (TN, 8) — reused by every slab dot
    n_slabs = tm // slab

    def slab_body(s, carry):
        off = pl.multiple_of(s * slab, slab)
        y_slab = ya_ref[0, :, pl.ds(off, slab)]                # (8, slab)
        # One small MXU contraction emits squared distances for this slab.
        d = jnp.dot(xa, y_slab,
                    preferred_element_type=jnp.float32,
                    precision=jax.lax.Precision.HIGHEST)       # (TN, slab)
        # dist1: elementwise (VPU) lane-slab fold; cross-lane reduce deferred.
        acc1_ref[...] = jnp.minimum(acc1_ref[...], d)
        # dist2: sublane reduce of this slab, streamed into the resident
        # per-(b, i) block at its global lane offset (clamped vs cancellation).
        colmin = jnp.maximum(jnp.min(d, axis=0, keepdims=True), 0.0)  # (1, slab)
        goff = pl.multiple_of(j * tm + off, slab)
        cur = d2_ref[0, 0, :, pl.ds(goff, slab)]                      # (1, slab)
        d2_ref[0, 0, :, pl.ds(goff, slab)] = jnp.minimum(cur, colmin)
        return carry

    jax.lax.fori_loop(0, n_slabs, slab_body, 0, unroll=True)

    # Epilogue once per (b, i): one XLU transpose + sublane reduce gives a
    # lane-dense (1, TN) dist1 row (unmasked stores, dense writeback DMA).
    @pl.when(j == nj - 1)
    def _():
        acc_t = jnp.transpose(acc1_ref[...], (1, 0))           # (slab, TN)
        d1_ref[0] = jnp.maximum(jnp.min(acc_t, axis=0, keepdims=True), 0.0)


def chamfer_distance(xyz1, xyz2, *, tn=256, tm=2048, slab=128):
    """Pallas forward pass of ChamferLoss. Returns (dist1, dist2)."""
    B, N, C = xyz1.shape
    B2, M, C2 = xyz2.shape
    assert B == B2 and C == 3 and C2 == 3
    assert slab % 128 == 0

    # Tile sizes: lane-dim multiples of 128 / slab; shrink for small clouds.
    TN = max(128, min(_round_up(tn, 128), _round_up(N, 128)))
    TM = max(slab, min(_round_up(tm, slab), _round_up(M, slab)))
    Np = _round_up(N, TN)
    Mp = _round_up(M, TM)
    Ni = Np // TN
    assert TM % slab == 0 and Np % TN == 0 and Mp % TM == 0

    x = xyz1.astype(jnp.float32)
    y = xyz2.astype(jnp.float32)
    BIG = 1e30  # padded points get a huge norm term -> never win a min

    xsq = jnp.sum(x * x, axis=-1)   # (B, N)
    ysq = jnp.sum(y * y, axis=-1)   # (B, M)

    # Augmented x: rows of [-2x, ||x||^2, 1, 0, 0, 0], points in sublanes.
    xa = jnp.zeros((B, Np, 8), jnp.float32)
    xa = xa.at[:, :N, 0:3].set(-2.0 * x)
    xa = xa.at[:, :N, 3].set(xsq)
    xa = xa.at[:, N:, 3].set(BIG)          # padded x -> huge distances
    xa = xa.at[:, :N, 4].set(1.0)

    # Augmented y: rows of [y, 1, ||y||^2, 0, 0, 0], point index lane-dense.
    ya = jnp.zeros((B, 8, Mp), jnp.float32)
    ya = ya.at[:, 0:3, :M].set(jnp.transpose(y, (0, 2, 1)))
    ya = ya.at[:, 3, :M].set(1.0)
    ya = ya.at[:, 4, :M].set(ysq)
    ya = ya.at[:, 4, M:].set(BIG)          # padded y -> huge distances

    grid = (B, Ni, Mp // TM)

    d1, d2p = pl.pallas_call(
        functools.partial(_chamfer_kernel, tm=TM, slab=slab),
        out_shape=(
            jax.ShapeDtypeStruct((B, 1, Np), jnp.float32),      # lane-dense dist1
            jax.ShapeDtypeStruct((B, Ni, 1, Mp), jnp.float32),  # dist2 partials
        ),
        grid_spec=pltpu.PrefetchScalarGridSpec(
            num_scalar_prefetch=0,
            grid=grid,
            in_specs=[
                pl.BlockSpec((1, TN, 8), lambda b, i, j: (b, i, 0)),
                pl.BlockSpec((1, 8, TM), lambda b, i, j: (b, 0, j)),
            ],
            out_specs=[
                pl.BlockSpec((1, 1, TN), lambda b, i, j: (b, 0, i)),
                pl.BlockSpec((1, 1, 1, Mp), lambda b, i, j: (b, i, 0, 0)),
            ],
            scratch_shapes=[pltpu.VMEM((TN, slab), jnp.float32)],
        ),
        compiler_params=pltpu.CompilerParams(
            # batch & N-tile axes are independent (per-(b, i) outputs) ->
            # "parallel" so v7x megacore can split them; the M-tile axis
            # carries the resident accumulators -> "arbitrary".
            dimension_semantics=("parallel", "parallel", "arbitrary"),
        ),
    )(xa, ya)

    # Invariant: padded-x x padded-y cells of the augmented contraction are 0;
    # they land only in padded output rows/cols, which are sliced off here.
    # Do not expose the padded region without re-masking.
    dist1 = d1[:, 0, :N]                                     # (B, N)
    dist2 = jnp.min(d2p[:, :, 0, :], axis=1)[:, :M]          # (B, M)
    return dist1, dist2


def _chamfer_reference(xyz1, xyz2):
    diff = xyz1[:, :, None, :] - xyz2[:, None, :, :]   # (B, N, M, 3)
    d = jnp.sum(diff * diff, axis=-1)                  # (B, N, M)
    return jnp.min(d, axis=2), jnp.min(d, axis=1)      # (B, N), (B, M)


if __name__ == "__main__":
    key = jax.random.PRNGKey(0)
    k1, k2, k3, k4, k5, k6 = jax.random.split(key, 6)

    # Small case (matches the module's toy usage); single tile / single slab.
    B, N, M = 2, 16, 8
    xyz1 = jax.random.normal(k1, (B, N, 3), dtype=jnp.float32)
    xyz2 = jax.random.normal(k2, (B, M, 3), dtype=jnp.float32)
    dist1, dist2 = chamfer_distance(xyz1, xyz2)
    jax.block_until_ready((dist1, dist2))
    ref1, ref2 = _chamfer_reference(xyz1, xyz2)
    assert dist1.shape == (B, N) and dist2.shape == (B, M)
    assert jnp.allclose(dist1, ref1, atol=1e-4, rtol=1e-4)
    assert jnp.allclose(dist2, ref2, atol=1e-4, rtol=1e-4)

    # Multi-tile case: exercises N/M tiling, multiple slabs, padding masks and
    # the per-(b, i) dist2 partial combine.
    B2, N2, M2 = 2, 300, 260
    xyz1b = jax.random.normal(k3, (B2, N2, 3), dtype=jnp.float32)
    xyz2b = jax.random.normal(k4, (B2, M2, 3), dtype=jnp.float32)
    d1b, d2b = chamfer_distance(xyz1b, xyz2b, tn=128, tm=256)
    jax.block_until_ready((d1b, d2b))
    r1b, r2b = _chamfer_reference(xyz1b, xyz2b)
    assert d1b.shape == (B2, N2) and d2b.shape == (B2, M2)
    assert jnp.allclose(d1b, r1b, atol=1e-4, rtol=1e-3)
    assert jnp.allclose(d2b, r2b, atol=1e-4, rtol=1e-3)

    # Default-tile case with B=1: multi-slab inner loop, N-tile parallelism.
    B3, N3, M3 = 1, 700, 513
    xyz1c = jax.random.normal(k5, (B3, N3, 3), dtype=jnp.float32)
    xyz2c = jax.random.normal(k6, (B3, M3, 3), dtype=jnp.float32)
    d1c, d2c = chamfer_distance(xyz1c, xyz2c)
    jax.block_until_ready((d1c, d2c))
    r1c, r2c = _chamfer_reference(xyz1c, xyz2c)
    assert d1c.shape == (B3, N3) and d2c.shape == (B3, M3)
    assert jnp.allclose(d1c, r1c, atol=1e-4, rtol=1e-3)
    assert jnp.allclose(d2c, r2c, atol=1e-4, rtol=1e-3)

    print("KERNEL_OK")
</pallas_src>

<mosaic_0001>
module attributes {stable_mosaic.version = 11 : i64} {
  func.func @_chamfer_kernel(%arg0: i32, %arg1: i32, %arg2: i32, %arg3: memref<1x128x8xf32, #tpu.memory_space<vmem>>, %arg4: memref<1x8x128xf32, #tpu.memory_space<vmem>>, %arg5: memref<1x1x128xf32, #tpu.memory_space<vmem>>, %arg6: memref<1x1x1x128xf32, #tpu.memory_space<vmem>>, %arg7: memref<128x128xf32, #tpu.memory_space<vmem>>) attributes {dimension_semantics = [#tpu.dimension_semantics<parallel>, #tpu.dimension_semantics<parallel>, #tpu.dimension_semantics<arbitrary>], iteration_bounds = array<i64: 2, 1, 1>, scalar_prefetch = 0 : i64, scratch_operands = 1 : i64, tpu.core_type = #tpu.core_type<tc>, window_params = [{transform_indices = @transform_0, window_bounds = array<i64: 1, 128, 8>}, {transform_indices = @transform_1, window_bounds = array<i64: 1, 8, 128>}, {transform_indices = @transform_2, window_bounds = array<i64: 1, 1, 128>}, {transform_indices = @transform_3, window_bounds = array<i64: 1, 1, 1, 128>}]} {
    %c0_i32 = arith.constant 0 : i32
    %0 = arith.cmpi eq, %arg2, %c0_i32 : i32
    %1 = arith.extui %0 : i1 to i32
    %c0_i32_0 = arith.constant 0 : i32
    %2 = arith.cmpi ne, %1, %c0_i32_0 : i32
    scf.if %2 {
      %cst_21 = arith.constant 0x7F800000 : f32
      %32 = vector.broadcast %cst_21 : f32 to vector<128x128xf32>
      %c0_22 = arith.constant 0 : index
      %c0_23 = arith.constant 0 : index
      %33 = vector.load %arg7[%c0_22, %c0_23] : memref<128x128xf32, #tpu.memory_space<vmem>>, vector<128x128xf32>
      tpu.vector_store %arg7[%c0_22, %c0_23], %32 {strides = array<i32>} : memref<128x128xf32, #tpu.memory_space<vmem>>, vector<128x128xf32>,
      %cst_24 = arith.constant 0x7F800000 : f32
      %34 = vector.broadcast %cst_24 : f32 to vector<1x1x1x128xf32>
      %c0_25 = arith.constant 0 : index
      %c0_26 = arith.constant 0 : index
      %c0_27 = arith.constant 0 : index
      %c0_28 = arith.constant 0 : index
      %35 = vector.load %arg6[%c0_25, %c0_26, %c0_27, %c0_28] : memref<1x1x1x128xf32, #tpu.memory_space<vmem>>, vector<1x1x1x128xf32>
      tpu.vector_store %arg6[%c0_25, %c0_26, %c0_27, %c0_28], %34 {strides = array<i32>} : memref<1x1x1x128xf32, #tpu.memory_space<vmem>>, vector<1x1x1x128xf32>,
    } else {
    }
    %c0 = arith.constant 0 : index
    %c0_1 = arith.constant 0 : index
    %c0_2 = arith.constant 0 : index
    %3 = vector.load %arg3[%c0, %c0_1, %c0_2] : memref<1x128x8xf32, #tpu.memory_space<vmem>>, vector<1x128x8xf32>
    %4 = vector.shape_cast %3 : vector<1x128x8xf32> to vector<128x8xf32>
    %c0_i32_3 = arith.constant 0 : i32
    %c128_i32 = arith.constant 128 : i32
    %5 = arith.muli %c0_i32_3, %c128_i32 : i32
    %6 = tpu.assume_multiple %5, 128 : i32
    %c0_4 = arith.constant 0 : index
    %c0_5 = arith.constant 0 : index
    %7 = arith.index_cast %6 : i32 to index
    %8 = vector.load %arg4[%c0_4, %c0_5, %7] : memref<1x8x128xf32, #tpu.memory_space<vmem>>, vector<1x8x128xf32>
    %9 = vector.shape_cast %8 : vector<1x8x128xf32> to vector<8x128xf32>
    %cst = arith.constant dense<0.000000e+00> : vector<128x128xf32>
    %10 = tpu.matmul %4, %9, %cst {dimension_numbers = #tpu.dot_dimension_numbers<[1], [0], [0], [1], [0, 0, 1, 1], [], []>, precision = #tpu.contract_precision<fp32>} : vector<128x8xf32>, vector<8x128xf32>, vector<128x128xf32> -> vector<128x128xf32>
    %c0_6 = arith.constant 0 : index
    %c0_7 = arith.constant 0 : index
    %11 = vector.load %arg7[%c0_6, %c0_7] : memref<128x128xf32, #tpu.memory_space<vmem>>, vector<128x128xf32>
    %12 = arith.minimumf %11, %10 : vector<128x128xf32>
    %c0_8 = arith.constant 0 : index
    %c0_9 = arith.constant 0 : index
    %13 = vector.load %arg7[%c0_8, %c0_9] : memref<128x128xf32, #tpu.memory_space<vmem>>, vector<128x128xf32>
    tpu.vector_store %arg7[%c0_8, %c0_9], %12 {strides = array<i32>} : memref<128x128xf32, #tpu.memory_space<vmem>>, vector<128x128xf32>,
    %cst_10 = arith.constant dense<0x7F800000> : vector<128xf32>
    %14 = vector.multi_reduction <minimumf>, %10, %cst_10 [0] : vector<128x128xf32> to vector<128xf32>
    %15 = vector.shape_cast %14 : vector<128xf32> to vector<1x128xf32>
    %cst_11 = arith.constant 0.000000e+00 : f32
    %16 = vector.broadcast %cst_11 : f32 to vector<1x128xf32>
    %17 = arith.maximumf %15, %16 : vector<1x128xf32>
    %c128_i32_12 = arith.constant 128 : i32
    %18 = arith.muli %arg2, %c128_i32_12 : i32
    %19 = arith.addi %18, %6 : i32
    %20 = tpu.assume_multiple %19, 128 : i32
    %c0_13 = arith.constant 0 : index
    %c0_14 = arith.constant 0 : index
    %c0_15 = arith.constant 0 : index
    %21 = arith.index_cast %20 : i32 to index
    %22 = vector.load %arg6[%c0_13, %c0_14, %c0_15, %21] : memref<1x1x1x128xf32, #tpu.memory_space<vmem>>, vector<1x1x1x128xf32>
    %23 = vector.shape_cast %22 : vector<1x1x1x128xf32> to vector<1x128xf32>
    %24 = arith.minimumf %23, %17 : vector<1x128xf32>
    %c0_16 = arith.constant 0 : index
    %c0_17 = arith.constant 0 : index
    %c0_18 = arith.constant 0 : index
    %25 = arith.index_cast %20 : i32 to index
    %26 = vector.load %arg6[%c0_16, %c0_17, %c0_18, %25] : memref<1x1x1x128xf32, #tpu.memory_space<vmem>>, vector<1x1x1x128xf32>
    %27 = vector.shape_cast %26 : vector<1x1x1x128xf32> to vector<1x128xf32>
    %28 = vector.shape_cast %24 : vector<1x128xf32> to vector<1x1x1x128xf32>
    tpu.vector_store %arg6[%c0_16, %c0_17, %c0_18, %25], %28 {strides = array<i32>} : memref<1x1x1x128xf32, #tpu.memory_space<vmem>>, vector<1x1x1x128xf32>,
    %c1_i32 = arith.constant 1 : i32
    %c0_i32_19 = arith.constant 0 : i32
    %29 = arith.cmpi eq, %arg2, %c0_i32_19 : i32
    %30 = arith.extui %29 : i1 to i32
    %c0_i32_20 = arith.constant 0 : i32
    %31 = arith.cmpi ne, %30, %c0_i32_20 : i32
    scf.if %31 {
      %c0_21 = arith.constant 0 : index
      %c0_22 = arith.constant 0 : index
      %32 = vector.load %arg7[%c0_21, %c0_22] : memref<128x128xf32, #tpu.memory_space<vmem>>, vector<128x128xf32>
      %33 = tpu.transpose %32, [1, 0] : vector<128x128xf32> -> vector<128x128xf32>
      %cst_23 = arith.constant dense<0x7F800000> : vector<128xf32>
      %34 = vector.multi_reduction <minimumf>, %33, %cst_23 [0] : vector<128x128xf32> to vector<128xf32>
      %35 = vector.shape_cast %34 : vector<128xf32> to vector<1x128xf32>
      %cst_24 = arith.constant 0.000000e+00 : f32
      %36 = vector.broadcast %cst_24 : f32 to vector<1x128xf32>
      %37 = arith.maximumf %35, %36 : vector<1x128xf32>
      %c0_25 = arith.constant 0 : index
      %c0_26 = arith.constant 0 : index
      %c0_27 = arith.constant 0 : index
      %38 = vector.load %arg5[%c0_25, %c0_26, %c0_27] : memref<1x1x128xf32, #tpu.memory_space<vmem>>, vector<1x1x128xf32>
      %39 = vector.shape_cast %38 : vector<1x1x128xf32> to vector<1x128xf32>
      %40 = vector.shape_cast %37 : vector<1x128xf32> to vector<1x1x128xf32>
      tpu.vector_store %arg5[%c0_25, %c0_26, %c0_27], %40 {strides = array<i32>} : memref<1x1x128xf32, #tpu.memory_space<vmem>>, vector<1x1x128xf32>,
    } else {
    }
    return
  }
  func.func @transform_0(%arg0: i32, %arg1: i32, %arg2: i32) -> (i32, i32, i32) {
    %c0_i32 = arith.constant 0 : i32
    %c0_i32_0 = arith.constant 0 : i32
    return %arg0, %arg1, %c0_i32 : i32, i32, i32
  }
  func.func @transform_1(%arg0: i32, %arg1: i32, %arg2: i32) -> (i32, i32, i32) {
    %c0_i32 = arith.constant 0 : i32
    %c0_i32_0 = arith.constant 0 : i32
    return %arg0, %c0_i32, %arg2 : i32, i32, i32
  }
  func.func @transform_2(%arg0: i32, %arg1: i32, %arg2: i32) -> (i32, i32, i32) {
    %c0_i32 = arith.constant 0 : i32
    %c0_i32_0 = arith.constant 0 : i32
    return %arg0, %c0_i32, %arg1 : i32, i32, i32
  }
  func.func @transform_3(%arg0: i32, %arg1: i32, %arg2: i32) -> (i32, i32, i32, i32) {
    %c0_i32 = arith.constant 0 : i32
    %c0_i32_0 = arith.constant 0 : i32
    %c0_i32_1 = arith.constant 0 : i32
    return %arg0, %arg1, %c0_i32, %c0_i32_0 : i32, i32, i32, i32
  }
}

</mosaic_0001>

<bundles_post_ra>
// kernel: tpu_custom_call.1
= control target key start
LH: loop header
LB: loop body
LE: loop exit
PB: predicated region body
PF: predicated region fallthrough
CT: control target
= control target key end

     0   :  { %9 = vsyncpa [#allocation4], 0  ;;  %s1916_s0 = inlined_call_operand.vmem [shape: f32[2,128,8], index: 0, kind: input, shape index: {}]   ;;  %s1917_s1 = inlined_call_operand.vmem [shape: f32[2,8,128], index: 1, kind: input, shape index: {}]   ;;  %s1918_s2 = inlined_call_operand.hbm [shape: f32[2,1,128], index: 2, kind: output, shape index: {0}]   ;;  %s1919_s3 = inlined_call_operand.hbm [shape: f32[2,1,1,128], index: 3, kind: output, shape index: {1}]  }
   0x1   :  { %11 = vsyncpa [#allocation4 + $0x1], 0 }
   0x2   :  { %12 = vsyncpa [#allocation6], 0 }
   0x3   :  { %14 = vsyncpa [#allocation6 + $0x1], 0  ;;  %s1452_s12 = smov 0   ;;  %s1454_s13 = smov 0  }
   0x4   :  { %s1456_s14 = smov 0   ;;  %s1458_s15 = smov 0  }
   0x5   :  { %s1460_s16 = smov 0   ;;  %s1462_s17 = smov 0  }
   0x6 LB: > { %s1245_s18 = sadd.s32 4294967295, %s1429_s17   ;;  %s1246_s19 = sadd.s32 4294967294, %s1429_s17   ;;  %s1429_s17 = sphi %s1462_s17, %s20_s17   ;;  %s1425_s16 = sphi %s1460_s16, %s1926_s16   ;;  %s1421_s15 = sphi %s1458_s15, %s1925_s15   ;;  %s1417_s14 = sphi %s1456_s14, %s1924_s14   ;;  %s1413_s13 = sphi %s1454_s13, %s1923_s13   ;;  %s1409_s12 = sphi %s1452_s12, %s1922_s12  }
   0x7   : > { %s39_s20 = sadd.s32 1, %s1425_s16  ;;  %s104_s21 = sadd.s32 1, %s1417_s14 }
   0x8   : > { %p41_p0 = scmp.ge.s32.totalorder %s39_s20, 2  ;;  %p114_p1 = scmp.ne.s32.totalorder %s1417_s14, %s1413_s13 }
   0x9   : > { %p115_p2 = scmp.eq.s32.totalorder %s1245_s18, 1  ;;  %p120_p3 = scmp.ne.s32.totalorder %s1413_s13, %s1409_s12 }
   0xa   : > { %s1928_s20 = smov (%p41_p0, %s39_s20), 0  ;;  %p121_p5 = scmp.eq.s32.totalorder %s1246_s19, 1 }
   0xb   : > { %p1492_p4 = por %p115_p2, %p114_p1  ;;  %s99_s23 = ssub.s32 %s1425_s16, %s1928_s20 }
   0xc   : > { %p1249_p6 = scmp.ge.s32.totalorder %s1429_s17, 1  ;;  %p102_p7 = scmp.eq.s32.totalorder %s99_s23, 0 }
   0xd   : > { %p1499_p8 = por %p121_p5, %p120_p3  ;;  %p190_p9 = scmp.lt.s32.totalorder %s1429_s17, 3 }
   0xe   : > { %s1505_s25 = scalar_select %p102_p7, %s1417_s14, %s104_s21  }
   0xf   : > { %p191_p10 = pnand %p1249_p6, %p190_p9 }
  0x10   : > { %p229_p11 = scmp.lt.s32.totalorder (!%p191_p10), %s1421_s15, 1  ;;  %s1851_s8 = sand.u32 (!%p191_p10), 1, %s1413_s13  }
  0x11   : > { %194 = sbr.rel (%p191_p10) target bundleno = 551 (0x227), region = 28  ;;  %s1855_s9 = scalar_lea.vmem (!%p191_p10), [#allocation5], %s1851_s8 }
  0x12   : > { %s1123_s18 = scalar_lea.hbm (!%p191_p10), %s1919_s3, %s1421_s15  ;;  %s1125_s19 = sshll.u32 (!%p191_p10), %s1855_s9, 4  ;;  %s1126_s19 = int_to_ptr.vmem [resolvable:$true] %s1125_s19 }
  0x13   : > { %s1127_s21 = sshll.u32 (!%p191_p10), %s1123_s18, 4  ;;  %s1100_s23 = scalar_lea.sflag (!%p191_p10), [#allocation6], %s1851_s8  ;;  %s1128_s21 = int_to_ptr.hbm [resolvable:$true] %s1127_s21 }
  0x14   : > { %s1339_s30 = scalar_lea.hbm (!%p191_p10), %s1919_s3, 2 }
  0x16   : > { %s230_s26 = scalar_select %p229_p11, %s1421_s15, 1  ;;  %vm283_vm0 = vcmask 64512  }
  0x18   : > { %s1255_s27 = sshll.u32 %s230_s26, 7  ;;  %s1252_s28 = sshll.u32 %s230_s26, 3 }
  0x19   : > { %s1512_s4 = scalar_lea.vmem %s1916_s0, %s1255_s27  ;;  %s244_s7 = scalar_lea.vmem %s1917_s1, %s1252_s28 }
  0x1a   : > { %v282_v0 = vld [vmem:[%s244_s7] sm:$0xff]  ;;  %v275_v2 = vld [vmem:[%s1512_s4 + $0x48] sm:$0xff]  ;;  %v276_v11 = vld [vmem:[%s1512_s4 + $0x50] sm:$0xff]  ;;  %s1333_s26 = sshra.s32 %s1128_s21, 4  ;;  %s1334_s26 = int_to_ptr.hbm [resolvable:$true] %s1333_s26 }
  0x1b   : > { %v274_v1 = vld [vmem:[%s1512_s4 + $0x40] sm:$0xff]  ;;  %v347_v3 = vand.u32 4294901760, %v282_v0  ;;  %v312_v5 = vsel %vm283_vm0, %v275_v2, 0  ;;  %v267_v7 = vld [vmem:[%s1512_s4 + $0x8] sm:$0xff]  ;;  %v268_v15 = vld [vmem:[%s1512_s4 + $0x10] sm:$0xff]  ;;  %v315_v21 = vsel %vm283_vm0, %v276_v11, 0  ;;  %p1340_p1 = scmp.lt.s32.totalorder %s1334_s26, %s1919_s3 }
  0x1c   : > { %v309_v4 = vsel %vm283_vm0, %v274_v1, 0  ;;  %v266_v6 = vld [vmem:[%s1512_s4] sm:$0xff]  ;;  %v1525_v9 = vand.u32 4294901760, %v312_v5  ;;  %v288_v14 = vsel %vm283_vm0, %v267_v7, 0  ;;  %v291_v24 = vsel %vm283_vm0, %v268_v15, 0  ;;  %v277_v35 = vld [vmem:[%s1512_s4 + $0x58] sm:$0xff] }
  0x1d   : > { %v1523_v8 = vand.u32 4294901760, %v309_v4  ;;  %v285_v10 = vsel %vm283_vm0, %v266_v6, 0  ;;  %1256 = vmatpush.msra.mxu2 %v347_v3  ;;  %v494_v12 = vsub.f32 %v282_v0, %v347_v3  ;;  %348 = vmatpush.msra.mxu0 %v347_v3  ;;  %v1539_v18 = vand.u32 4294901760, %v288_v14  ;;  %v269_v37 = vld [vmem:[%s1512_s4 + $0x18] sm:$0xff]  ;;  %v278_v50 = vld [vmem:[%s1512_s4 + $0x60] sm:$0xff]  ;;  %v279_v0 = vld [vmem:[%s1512_s4 + $0x68] sm:$0xff] }
  0x1e   : > { %v1529_v13 = vand.u32 4294901760, %v285_v10  ;;  %v1537_v17 = vsub.f32 %v312_v5, %v1525_v9  ;;  %v1555_v29 = vand.u32 4294901760, %v315_v21  ;;  %v1561_v33 = vand.u32 4294901760, %v291_v24  ;;  %v270_v51 = vld [vmem:[%s1512_s4 + $0x20] sm:$0xff]  ;;  %v271_v1 = vld [vmem:[%s1512_s4 + $0x28] sm:$0xff]  ;;  %s1335_s27 = scalar_lea.hbm %s1334_s26, 1 }
  0x1f   : > { %v1534_v16 = vsub.f32 %v309_v4, %v1523_v8  ;;  %v495_v19 = vand.u32 4294901760, %v494_v12  ;;  %581 = vmatpush.msrb.mxu2 %v494_v12  ;;  %v1547_v23 = vsub.f32 %v288_v14, %v1539_v18  ;;  %v318_v41 = vsel %vm283_vm0, %v277_v35, 0  ;;  %p1336_p12 = scmp.ne.s32.totalorder %s1334_s26, %s1335_s27  ;;  %p1341_p2 = scmp.lt.s32.totalorder %s1339_s30, %s1335_s27 }
  0x20   : > { %v1542_v20 = vsub.f32 %v285_v10, %v1529_v13  ;;  %v423_v28 = vand.u32 4294901760, %v1537_v17  ;;  %v1570_v39 = vsub.f32 %v315_v21, %v1555_v29  ;;  %v1577_v42 = vsub.f32 %v291_v24, %v1561_v33  ;;  %v280_v21 = vld [vmem:[%s1512_s4 + $0x70] sm:$0xff] }
  0x21   : > { %v415_v22 = vand.u32 4294901760, %v1534_v16  ;;  %v496_v25 = vsub.f32 %v494_v12, %v495_v19  ;;  %795 = vmatpush.msrb.mxu0 %v495_v19  ;;  %v359_v32 = vand.u32 4294901760, %v1547_v23  ;;  %v294_v43 = vsel %vm283_vm0, %v269_v37, 0  ;;  %v272_v24 = vld [vmem:[%s1512_s4 + $0x30] sm:$0xff]  ;;  %p1337_p13 = pnand %p1336_p12, %p1492_p4  ;;  %p1342_p3 = por %p1341_p2, %p1340_p1 }
  0x22   : > { %v351_v26 = vand.u32 4294901760, %v1542_v20  ;;  %v424_v38 = vsub.f32 %v1537_v17, %v423_v28  ;;  %v431_v45 = vand.u32 4294901760, %v1570_v39  ;;  %v1582_v46 = vand.u32 4294901760, %v318_v41 }
  0x23   : > { %v416_v27 = vsub.f32 %v1534_v16, %v415_v22  ;;  %v497_v30 = vand.u32 4294901760, %v496_v25  ;;  %v360_v40 = vsub.f32 %v1547_v23, %v359_v32  ;;  %v367_v48 = vand.u32 4294901760, %v1577_v42  ;;  %p1338_p0 = pneg %p1337_p13 }
  0x24   : > { %v352_v31 = vsub.f32 %v1542_v20, %v351_v26  ;;  %v425_v44 = vand.u32 4294901760, %v424_v38  ;;  %v1585_v49 = vand.u32 4294901760, %v294_v43  ;;  %v432_v52 = vsub.f32 %v1570_v39, %v431_v45 }
  0x25   : > { %v417_v34 = vand.u32 4294901760, %v416_v27  ;;  %1257 = vmatpush.msra.mxu3 %v497_v30  ;;  %498 = vmatpush.msra.mxu1 %v497_v30  ;;  %v361_v47 = vand.u32 4294901760, %v360_v40  ;;  %v1594_v53 = vsub.f32 %v318_v41, %v1582_v46  ;;  %v368_v54 = vsub.f32 %v1577_v42, %v367_v48  ;;  %p1343_p5 = pnand %p1342_p3, %p1338_p0 }
  0x26   : > { %v353_v36 = vand.u32 4294901760, %v352_v31  ;;  %532 = vmatmul.f32.vlgmr.msra.gmra.mxu3 %v1523_v8  ;;  %500 = vmatmul.f32.vlgmr.msra.gmra.mxu1 %v1529_v13  ;;  %v321_v55 = vsel %vm283_vm0, %v278_v50, 0  ;;  %v1601_v56 = vsub.f32 %v294_v43, %v1585_v49  ;;  %v297_v57 = vsel %vm283_vm0, %v270_v51, 0 }
  0x27   : > { %418 = vmatmul.f32.vlgmr.msra.gmra.mxu2 %v417_v34  ;;  %679 = vmatpush.msrb.mxu3 %v347_v3  ;;  %v433_v58 = vand.u32 4294901760, %v432_v52  ;;  %v439_v59 = vand.u32 4294901760, %v1594_v53  ;;  %v1606_v60 = vand.u32 4294901760, %v321_v55  ;;  %v369_v61 = vand.u32 4294901760, %v368_v54 }
  0x28   : > { %354 = vmatmul.f32.vlgmr.msra.gmra.mxu0 %v353_v36  ;;  %877 = vmatpush.msrb.mxu1 %v347_v3  ;;  %v375_v62 = vand.u32 4294901760, %v1601_v56  ;;  %v1609_v63 = vand.u32 4294901760, %v297_v57  ;;  %v324_v5 = vsel %vm283_vm0, %v279_v0, 0  ;;  %v300_v7 = vsel %vm283_vm0, %v271_v1, 0 }
  0x29   : > { %v440_v2 = vsub.f32 %v1594_v53, %v439_v59  ;;  %v1618_v3 = vsub.f32 %v321_v55, %v1606_v60  ;;  %v1630_v12 = vand.u32 4294901760, %v324_v5  ;;  %v1633_v19 = vand.u32 4294901760, %v300_v7 }
  0x2a   : > { %v376_v4 = vsub.f32 %v1601_v56, %v375_v62  ;;  %v1625_v6 = vsub.f32 %v297_v57, %v1609_v63  ;;  %v327_v31 = vsel %vm283_vm0, %v280_v21, 0  ;;  %v303_v35 = vsel %vm283_vm0, %v272_v24, 0 }
  0x2b   : > { %v441_v10 = vand.u32 4294901760, %v440_v2  ;;  %v447_v11 = vand.u32 4294901760, %v1618_v3  ;;  %v1642_v27 = vsub.f32 %v324_v5, %v1630_v12  ;;  %v1649_v34 = vsub.f32 %v300_v7, %v1633_v19 }
  0x2c   : > { %v377_v14 = vand.u32 4294901760, %v376_v4  ;;  %v383_v15 = vand.u32 4294901760, %v1625_v6  ;;  %v1654_v38 = vand.u32 4294901760, %v327_v31  ;;  %v1657_v43 = vand.u32 4294901760, %v303_v35 }
  0x2d   : > { %v448_v25 = vsub.f32 %v1618_v3, %v447_v11  ;;  %v455_v37 = vand.u32 4294901760, %v1642_v27  ;;  %v391_v41 = vand.u32 4294901760, %v1649_v34 }
  0x2e   : > { %536 = vmatmul.f32.gmra.mxu3 %v1525_v9  ;;  %504 = vmatmul.f32.gmra.mxu1 %v1539_v18  ;;  %v384_v30 = vsub.f32 %v1625_v6, %v383_v15  ;;  %v1666_v51 = vsub.f32 %v327_v31, %v1654_v38  ;;  %v398_v55 = vsub.f32 %v303_v35, %v1657_v43 }
  0x2f   : > { %426 = vmatmul.f32.gmra.mxu2 %v425_v44  ;;  %v449_v36 = vand.u32 4294901760, %v448_v25  ;;  %v281_v44 = vld [vmem:[%s1512_s4 + $0x78] sm:$0xff]  ;;  %v456_v50 = vsub.f32 %v1642_v27, %v455_v37  ;;  %v392_v52 = vsub.f32 %v1649_v34, %v391_v41 }
  0x30   : > { %362 = vmatmul.f32.gmra.mxu0 %v361_v47  ;;  %v385_v40 = vand.u32 4294901760, %v384_v30  ;;  %v273_v47 = vld [vmem:[%s1512_s4 + $0x38] sm:$0xff]  ;;  %v330_v54 = vsel %vm283_vm0, %v281_v44, 0  ;;  %v399_v2 = vand.u32 4294901760, %v398_v55 }
  0x31   : > { %v306_v57 = vsel %vm283_vm0, %v273_v47, 0  ;;  %v1676_v0 = vand.u32 4294901760, %v330_v54  ;;  %v393_v1 = vand.u32 4294901760, %v392_v52 }
  0x32   : > { %v405_v4 = vand.u32 4294901760, %v306_v57 }
  0x33   : > { %v1683_v7 = vsub.f32 %v330_v54, %v1676_v0 }
  0x35   : > { %v471_v24 = vand.u32 4294901760, %v1683_v7 }
  0x36   : > { %540 = vmatmul.f32.gmra.mxu3 %v1555_v29  ;;  %508 = vmatmul.f32.gmra.mxu1 %v1561_v33 }
  0x37   : > { %434 = vmatmul.f32.gmra.mxu2 %v433_v58  ;;  %v457_v58 = vand.u32 4294901760, %v456_v50  ;;  %v472_v31 = vsub.f32 %v1683_v7, %v471_v24 }
  0x38   : > { %370 = vmatmul.f32.gmra.mxu0 %v369_v61  ;;  %v463_v61 = vand.u32 4294901760, %v1666_v51 }
  0x3a   : > { %v464_v5 = vsub.f32 %v1666_v51, %v463_v61 }
  0x3c   : > { %v465_v21 = vand.u32 4294901760, %v464_v5 }
  0x3e   : > { %544 = vmatmul.f32.gmra.mxu3 %v1582_v46  ;;  %512 = vmatmul.f32.gmra.mxu1 %v1585_v49 }
  0x3f   : > { %442 = vmatmul.f32.gmra.mxu2 %v441_v10  ;;  %v400_v10 = vsub.f32 %v398_v55, %v399_v2 }
  0x40   : > { %378 = vmatmul.f32.gmra.mxu0 %v377_v14  ;;  %v406_v14 = vsub.f32 %v306_v57, %v405_v4 }
  0x41   : > { %v401_v25 = vand.u32 4294901760, %v400_v10 }
  0x42   : > { %v407_v30 = vand.u32 4294901760, %v406_v14 }
  0x44   : > { %v408_v35 = vsub.f32 %v406_v14, %v407_v30 }
  0x46   : > { %548 = vmatmul.f32.gmra.mxu3 %v1606_v60  ;;  %516 = vmatmul.f32.gmra.mxu1 %v1609_v63 }
  0x47   : > { %450 = vmatmul.f32.gmra.mxu2 %v449_v36  ;;  %v473_v36 = vand.u32 4294901760, %v472_v31 }
  0x48   : > { %386 = vmatmul.f32.gmra.mxu0 %v385_v40  ;;  %v409_v40 = vand.u32 4294901760, %v408_v35 }
  0x4e   : > { %552 = vmatmul.f32.gmra.mxu3 %v1630_v12  ;;  %520 = vmatmul.f32.gmra.mxu1 %v1633_v19 }
  0x4f   : > { %458 = vmatmul.f32.gmra.mxu2 %v457_v58 }
  0x50   : > { %394 = vmatmul.f32.gmra.mxu0 %v393_v1 }
  0x56   : > { %556 = vmatmul.f32.gmra.mxu3 %v1654_v38  ;;  %524 = vmatmul.f32.gmra.mxu1 %v1657_v43 }
  0x57   : > { %466 = vmatmul.f32.gmra.mxu2 %v465_v21 }
  0x58   : > { %402 = vmatmul.f32.gmra.mxu0 %v401_v25 }
  0x5e   : > { %560 = vmatmul.f32.gmra.mxu3 %v1676_v0  ;;  %528 = vmatmul.f32.gmra.mxu1 %v405_v4 }
  0x5f   : > { %474 = vmatmul.f32.gmra.mxu2 %v473_v36 }
  0x60   : > { %410 = vmatmul.f32.gmra.mxu0 %v409_v40 }
  0x66   : > { %683 = vmatmul.f32.vlgmr.msrb.gmra.mxu3 %v351_v26  ;;  %879 = vmatmul.f32.vlgmr.msrb.gmra.mxu1 %v1529_v13 }
  0x67   : > { %584 = vmatmul.f32.vlgmr.msrb.gmra.mxu2 %v1542_v20 }
  0x68   : > { %797 = vmatmul.f32.vlgmr.msrb.gmra.mxu0 %v1529_v13 }
  0x6e   : > { %689 = vmatmul.f32.gmra.mxu3 %v359_v32  ;;  %883 = vmatmul.f32.gmra.mxu1 %v1539_v18 }
  0x6f   : > { %589 = vmatmul.f32.gmra.mxu2 %v1547_v23 }
  0x70   : > { %801 = vmatmul.f32.gmra.mxu0 %v1539_v18 }
  0x76   : > { %695 = vmatmul.f32.gmra.mxu3 %v367_v48  ;;  %887 = vmatmul.f32.gmra.mxu1 %v1561_v33 }
  0x77   : > { %594 = vmatmul.f32.gmra.mxu2 %v1577_v42 }
  0x78   : > { %805 = vmatmul.f32.gmra.mxu0 %v1561_v33 }
  0x7e   : > { %701 = vmatmul.f32.gmra.mxu3 %v375_v62  ;;  %891 = vmatmul.f32.gmra.mxu1 %v1585_v49 }
  0x7f   : > { %599 = vmatmul.f32.gmra.mxu2 %v1601_v56 }
  0x80   : > { %809 = vmatmul.f32.gmra.mxu0 %v1585_v49 }
  0x86   : > { %707 = vmatmul.f32.gmra.mxu3 %v383_v15  ;;  %895 = vmatmul.f32.gmra.mxu1 %v1609_v63 }
  0x87   : > { %604 = vmatmul.f32.gmra.mxu2 %v1625_v6 }
  0x88   : > { %813 = vmatmul.f32.gmra.mxu0 %v1609_v63 }
  0x8e   : > { %713 = vmatmul.f32.gmra.mxu3 %v391_v41  ;;  %899 = vmatmul.f32.gmra.mxu1 %v1633_v19 }
  0x8f   : > { %609 = vmatmul.f32.gmra.mxu2 %v1649_v34 }
  0x90   : > { %817 = vmatmul.f32.gmra.mxu0 %v1633_v19 }
  0x96   : > { %719 = vmatmul.f32.gmra.mxu3 %v399_v2  ;;  %903 = vmatmul.f32.gmra.mxu1 %v1657_v43 }
  0x97   : > { %614 = vmatmul.f32.gmra.mxu2 %v398_v55 }
  0x98   : > { %821 = vmatmul.f32.gmra.mxu0 %v1657_v43 }
  0x9e   : > { %725 = vmatmul.f32.gmra.mxu3 %v407_v30  ;;  %907 = vmatmul.f32.gmra.mxu1 %v405_v4 }
  0x9f   : > { %619 = vmatmul.f32.gmra.mxu2 %v406_v14 }
  0xa0   : > { %825 = vmatmul.f32.gmra.mxu0 %v405_v4 }
  0xa3   : > { %v1727_v18 = vpop.f32.mrf.mxu1 }
  0xa5   : > { %v1725_v13 = vpop.f32.mrf.mxu0 }
  0xa6   : > { %731 = vmatmul.f32.gmra.mxu3 %v415_v22  ;;  %911 = vmatmul.f32.gmra.mxu1 %v1523_v8  ;;  %v502_v52 = vadd.f32 %v1727_v18, %v1725_v13 }
  0xa7   : > { %624 = vmatmul.f32.gmra.mxu2 %v1534_v16 }
  0xa8   : > { %829 = vmatmul.f32.gmra.mxu0 %v1523_v8 }
  0xa9   : > { %v533_v23 = vpop.f32.mrf.mxu3 }
  0xaa   : > { %v419_v20 = vpop.f32.mrf.mxu2 }
  0xab   : > { %v1734_v26 = vadd.f32 %v533_v23, %v419_v20  ;;  %v1738_v33 = vpop.f32.mrf.mxu1 }
  0xad   : > { %v1736_v32 = vpop.f32.mrf.mxu0 }
  0xae   : > { %737 = vmatmul.f32.gmra.mxu3 %v423_v28  ;;  %915 = vmatmul.f32.gmra.mxu1 %v1525_v9  ;;  %v506_v4 = vadd.f32 %v1738_v33, %v1736_v32 }
  0xaf   : > { %629 = vmatmul.f32.gmra.mxu2 %v1537_v17 }
  0xb0   : > { %833 = vmatmul.f32.gmra.mxu0 %v1525_v9 }
  0xb1   : > { %v537_v22 = vpop.f32.mrf.mxu3 }
  0xb2   : > { %v427_v16 = vpop.f32.mrf.mxu2 }
  0xb3   : > { %v1745_v8 = vadd.f32 %v537_v22, %v427_v16  ;;  %v1749_v48 = vpop.f32.mrf.mxu1 }
  0xb5   : > { %v1747_v42 = vpop.f32.mrf.mxu0 }
  0xb6   : > { %743 = vmatmul.f32.gmra.mxu3 %v431_v45  ;;  %919 = vmatmul.f32.gmra.mxu1 %v1555_v29  ;;  %v510_v30 = vadd.f32 %v1749_v48, %v1747_v42 }
  0xb7   : > { %634 = vmatmul.f32.gmra.mxu2 %v1570_v39 }
  0xb8   : > { %837 = vmatmul.f32.gmra.mxu0 %v1555_v29 }
  0xb9   : > { %v541_v28 = vpop.f32.mrf.mxu3 }
  0xba   : > { %v435_v17 = vpop.f32.mrf.mxu2 }
  0xbb   : > { %v1756_v9 = vadd.f32 %v541_v28, %v435_v17  ;;  %v1760_v56 = vpop.f32.mrf.mxu1 }
  0xbd   : > { %v1758_v49 = vpop.f32.mrf.mxu0 }
  0xbe   : > { %749 = vmatmul.f32.gmra.mxu3 %v439_v59  ;;  %923 = vmatmul.f32.gmra.mxu1 %v1582_v46  ;;  %v514_v32 = vadd.f32 %v1760_v56, %v1758_v49 }
  0xbf   : > { %639 = vmatmul.f32.gmra.mxu2 %v1594_v53 }
  0xc0   : > { %841 = vmatmul.f32.gmra.mxu0 %v1582_v46 }
  0xc1   : > { %v545_v45 = vpop.f32.mrf.mxu3 }
  0xc2   : > { %v443_v39 = vpop.f32.mrf.mxu2 }
  0xc3   : > { %v1767_v29 = vadd.f32 %v545_v45, %v443_v39  ;;  %v1771_v63 = vpop.f32.mrf.mxu1 }
  0xc5   : > { %v1769_v62 = vpop.f32.mrf.mxu0 }
  0xc6   : > { %755 = vmatmul.f32.gmra.mxu3 %v447_v11  ;;  %927 = vmatmul.f32.gmra.mxu1 %v1606_v60  ;;  %v518_v45 = vadd.f32 %v1771_v63, %v1769_v62 }
  0xc7   : > { %644 = vmatmul.f32.gmra.mxu2 %v1618_v3 }
  0xc8   : > { %845 = vmatmul.f32.gmra.mxu0 %v1606_v60 }
  0xc9   : > { %v549_v59 = vpop.f32.mrf.mxu3 }
  0xca   : > { %v451_v53 = vpop.f32.mrf.mxu2 }
  0xcb   : > { %v1778_v46 = vadd.f32 %v549_v59, %v451_v53  ;;  %v1782_v15 = vpop.f32.mrf.mxu1 }
  0xcd   : > { %v1780_v6 = vpop.f32.mrf.mxu0 }
  0xce   : > { %761 = vmatmul.f32.gmra.mxu3 %v455_v37  ;;  %931 = vmatmul.f32.gmra.mxu1 %v1630_v12 }
  0xcf   : > { %649 = vmatmul.f32.gmra.mxu2 %v1642_v27 }
  0xd0   : > { %849 = vmatmul.f32.gmra.mxu0 %v1630_v12 }
  0xd1   : > { %v553_v11 = vpop.f32.mrf.mxu3 }
  0xd2   : > { %v459_v3 = vpop.f32.mrf.mxu2 }
  0xd3   : > { %v1789_v60 = vadd.f32 %v553_v11, %v459_v3  ;;  %v1793_v34 = vpop.f32.mrf.mxu1 }
  0xd5   : > { %v1791_v19 = vpop.f32.mrf.mxu0 }
  0xd6   : > { %767 = vmatmul.f32.gmra.mxu3 %v463_v61  ;;  %935 = vmatmul.f32.gmra.mxu1 %v1654_v38 }
  0xd7   : > { %654 = vmatmul.f32.gmra.mxu2 %v1666_v51 }
  0xd8   : > { %853 = vmatmul.f32.gmra.mxu0 %v1654_v38 }
  0xd9   : > { %v557_v37 = vpop.f32.mrf.mxu3 }
  0xda   : > { %v467_v27 = vpop.f32.mrf.mxu2 }
  0xdb   : > { %v1800_v12 = vadd.f32 %v557_v37, %v467_v27  ;;  %v1804_v43 = vpop.f32.mrf.mxu1 }
  0xdd   : > { %v1802_v41 = vpop.f32.mrf.mxu0 }
  0xde   : > { %773 = vmatmul.f32.gmra.mxu3 %v471_v24  ;;  %939 = vmatmul.f32.gmra.mxu1 %v1676_v0 }
  0xdf   : > { %659 = vmatmul.f32.gmra.mxu2 %v1683_v7 }
  0xe0   : > { %857 = vmatmul.f32.gmra.mxu0 %v1676_v0 }
  0xe1   : > { %v561_v47 = vpop.f32.mrf.mxu3 }
  0xe2   : > { %v475_v44 = vpop.f32.mrf.mxu2 }
  0xe3   : > { %v1811_v38 = vadd.f32 %v561_v47, %v475_v44  ;;  %v880_v51 = vpop.f32.mrf.mxu1  ;;  %v522_v44 = vadd.f32 %v1782_v15, %v1780_v6 }
  0xe5   : > { %v798_v50 = vpop.f32.mrf.mxu0 }
  0xe9   : > { %v684_v55 = vpop.f32.mrf.mxu3 }
  0xea   : > { %v585_v54 = vpop.f32.mrf.mxu2 }
  0xeb   : > { %v586_v57 = vadd.f32 %v585_v54, %v502_v52  ;;  %v884_v1 = vpop.f32.mrf.mxu1 }
  0xed   : > { %v685_v58 = vadd.f32 %v684_v55, %v586_v57  ;;  %v802_v61 = vpop.f32.mrf.mxu0 }
  0xef   : > { %v799_v2 = vadd.f32 %v798_v50, %v685_v58  ;;  %v526_v58 = vadd.f32 %v1793_v34, %v1791_v19 }
  0xf1   : > { %v1817_v0 = vadd.f32 %v880_v51, %v799_v2  ;;  %v690_v7 = vpop.f32.mrf.mxu3 }
  0xf2   : > { %v590_v5 = vpop.f32.mrf.mxu2 }
  0xf3   : > { %v591_v10 = vadd.f32 %v590_v5, %v506_v4  ;;  %1040 = vxpose.xlu0.b32.start [1/16] %v1817_v0, 128  ;;  %v888_v24 = vpop.f32.mrf.mxu1 }
  0xf5   : > { %v691_v14 = vadd.f32 %v690_v7, %v591_v10  ;;  %v806_v21 = vpop.f32.mrf.mxu0  ;;  %v530_v10 = vadd.f32 %v1804_v43, %v1802_v41 }
  0xf7   : > { %v803_v25 = vadd.f32 %v802_v61, %v691_v14 }
  0xf9   : > { %v1822_v31 = vadd.f32 %v884_v1, %v803_v25  ;;  %v696_v36 = vpop.f32.mrf.mxu3 }
  0xfa   : > { %v595_v35 = vpop.f32.mrf.mxu2 }
  0xfb   : > { %v596_v40 = vadd.f32 %v595_v35, %v510_v30  ;;  %1041 = vxpose.xlu0.b32.cont [2/16] %v1822_v31, 128  ;;  %v892_v20 = vpop.f32.mrf.mxu1 }
  0xfd   : > { %v697_v13 = vadd.f32 %v696_v36, %v596_v40  ;;  %v810_v18 = vpop.f32.mrf.mxu0 }
  0xff   : > { %v807_v23 = vadd.f32 %v806_v21, %v697_v13 }
 0x101   : > { %v1827_v33 = vadd.f32 %v888_v24, %v807_v23  ;;  %v702_v22 = vpop.f32.mrf.mxu3 }
 0x102   : > { %v600_v16 = vpop.f32.mrf.mxu2 }
 0x103   : > { %v601_v17 = vadd.f32 %v600_v16, %v514_v32  ;;  %1042 = vxpose.xlu0.b32.cont [3/16] %v1827_v33, 128  ;;  %v896_v28 = vpop.f32.mrf.mxu1 }
 0x105   : > { %v703_v42 = vadd.f32 %v702_v22, %v601_v17  ;;  %v814_v48 = vpop.f32.mrf.mxu0 }
 0x107   : > { %v811_v39 = vadd.f32 %v810_v18, %v703_v42 }
 0x109   : > { %v1832_v53 = vadd.f32 %v892_v20, %v811_v39  ;;  %v708_v3 = vpop.f32.mrf.mxu3 }
 0x10a   : > { %v605_v59 = vpop.f32.mrf.mxu2 }
 0x10b   : > { %v606_v11 = vadd.f32 %v605_v59, %v518_v45  ;;  %1043 = vxpose.xlu0.b32.cont [4/16] %v1832_v53, 128  ;;  %v900_v27 = vpop.f32.mrf.mxu1 }
 0x10d   : > { %v709_v49 = vadd.f32 %v708_v3, %v606_v11  ;;  %v818_v56 = vpop.f32.mrf.mxu0 }
 0x10f   : > { %v815_v37 = vadd.f32 %v814_v48, %v709_v49 }
 0x111   : > { %v897_v47 = vadd.f32 %v896_v28, %v815_v37  ;;  %v714_v51 = vpop.f32.mrf.mxu3 }
 0x112   : > { %v610_v50 = vpop.f32.mrf.mxu2 }
 0x113   : > { %v991_v52 = vmin.f32 %v1817_v0, %v897_v47  ;;  %v611_v62 = vadd.f32 %v610_v50, %v522_v44  ;;  %1044 = vxpose.xlu0.b32.cont [5/16] %v897_v47, 128  ;;  %v904_v55 = vpop.f32.mrf.mxu1 }
 0x115   : > { %v715_v63 = vadd.f32 %v714_v51, %v611_v62  ;;  %v822_v54 = vpop.f32.mrf.mxu0 }
 0x117   : > { %v819_v57 = vadd.f32 %v818_v56, %v715_v63 }
 0x119   : > { %v901_v61 = vadd.f32 %v900_v27, %v819_v57  ;;  %v720_v2 = vpop.f32.mrf.mxu3 }
 0x11a   : > { %v615_v1 = vpop.f32.mrf.mxu2 }
 0x11b   : > { %v992_v4 = vmin.f32 %v1822_v31, %v901_v61  ;;  %v616_v6 = vadd.f32 %v615_v1, %v526_v58  ;;  %1045 = vxpose.xlu0.b32.cont [6/16] %v901_v61, 128  ;;  %v908_v7 = vpop.f32.mrf.mxu1 }
 0x11d   : > { %v721_v15 = vadd.f32 %v720_v2, %v616_v6  ;;  %v826_v5 = vpop.f32.mrf.mxu0 }
 0x11f   : > { %v823_v0 = vadd.f32 %v822_v54, %v721_v15 }
 0x121   : > { %v905_v14 = vadd.f32 %v904_v55, %v823_v0  ;;  %v726_v24 = vpop.f32.mrf.mxu3 }
 0x122   : > { %v620_v21 = vpop.f32.mrf.mxu2 }
 0x123   : > { %v993_v25 = vmin.f32 %v1827_v33, %v905_v14  ;;  %v621_v19 = vadd.f32 %v620_v21, %v530_v10  ;;  %1046 = vxpose.xlu0.b32.cont [7/16] %v905_v14, 128  ;;  %v912_v35 = vpop.f32.mrf.mxu1 }
 0x125   : > { %v727_v34 = vadd.f32 %v726_v24, %v621_v19  ;;  %v830_v30 = vpop.f32.mrf.mxu0 }
 0x127   : > { %v827_v31 = vadd.f32 %v826_v5, %v727_v34 }
 0x129   : > { %v909_v36 = vadd.f32 %v908_v7, %v827_v31  ;;  %v732_v13 = vpop.f32.mrf.mxu3 }
 0x12a   : > { %v625_v40 = vpop.f32.mrf.mxu2 }
 0x12b   : > { %v626_v18 = vadd.f32 %v625_v40, %v1734_v26  ;;  %1047 = vxpose.xlu0.b32.cont [8/16] %v909_v36, 128  ;;  %v916_v41 = vpop.f32.mrf.mxu1  ;;  %v994_v55 = vmin.f32 %v1832_v53, %v909_v36 }
 0x12d   : > { %v733_v20 = vadd.f32 %v732_v13, %v626_v18  ;;  %v834_v23 = vpop.f32.mrf.mxu0 }
 0x12f   : > { %v831_v43 = vadd.f32 %v830_v30, %v733_v20 }
 0x131   : > { %v913_v32 = vadd.f32 %v912_v35, %v831_v43  ;;  %v738_v22 = vpop.f32.mrf.mxu3 }
 0x132   : > { %v630_v16 = vpop.f32.mrf.mxu2 }
 0x133   : > { %v995_v33 = vmin.f32 %v991_v52, %v913_v32  ;;  %v631_v17 = vadd.f32 %v630_v16, %v1745_v8  ;;  %1048 = vxpose.xlu0.b32.cont [9/16] %v913_v32, 128  ;;  %v920_v28 = vpop.f32.mrf.mxu1 }
 0x135   : > { %v739_v42 = vadd.f32 %v738_v22, %v631_v17  ;;  %v838_v48 = vpop.f32.mrf.mxu0 }
 0x137   : > { %v835_v39 = vadd.f32 %v834_v23, %v739_v42 }
 0x139   : > { %v917_v45 = vadd.f32 %v916_v41, %v835_v39  ;;  %v744_v3 = vpop.f32.mrf.mxu3 }
 0x13a   : > { %v635_v59 = vpop.f32.mrf.mxu2 }
 0x13b   : > { %v996_v26 = vmin.f32 %v992_v4, %v917_v45  ;;  %v636_v11 = vadd.f32 %v635_v59, %v1756_v9  ;;  %1049 = vxpose.xlu0.b32.cont [10/16] %v917_v45, 128  ;;  %v924_v27 = vpop.f32.mrf.mxu1 }
 0x13d   : > { %v745_v49 = vadd.f32 %v744_v3, %v636_v11  ;;  %v842_v56 = vpop.f32.mrf.mxu0 }
 0x13f   : > { %v839_v37 = vadd.f32 %v838_v48, %v745_v49 }
 0x141   : > { %v921_v44 = vadd.f32 %v920_v28, %v839_v37  ;;  %v750_v50 = vpop.f32.mrf.mxu3 }
 0x142   : > { %v640_v47 = vpop.f32.mrf.mxu2 }
 0x143   : > { %v997_v8 = vmin.f32 %v993_v25, %v921_v44  ;;  %v641_v51 = vadd.f32 %v640_v47, %v1767_v29  ;;  %1050 = vxpose.xlu0.b32.cont [11/16] %v921_v44, 128  ;;  %v928_v54 = vpop.f32.mrf.mxu1 }
 0x145   : > { %v751_v52 = vadd.f32 %v750_v50, %v641_v51  ;;  %v846_v62 = vpop.f32.mrf.mxu0 }
 0x147   : > { %v843_v63 = vadd.f32 %v842_v56, %v751_v52 }
 0x149   : > { %v925_v9 = vadd.f32 %v924_v27, %v843_v63  ;;  %v756_v58 = vpop.f32.mrf.mxu3 }
 0x14a   : > { %v645_v57 = vpop.f32.mrf.mxu2 }
 0x14b   : > { %v998_v61 = vmin.f32 %v994_v55, %v925_v9  ;;  %v646_v1 = vadd.f32 %v645_v57, %v1778_v46  ;;  %1051 = vxpose.xlu0.b32.cont [12/16] %v925_v9, 128  ;;  %v932_v29 = vpop.f32.mrf.mxu1  ;;  %v1431_v46 = vmov inf  }
 0x14c   : > { %265 = vst [vmem:[%s1855_s9] sm:$0x1] %v1431_v46 }
 0x14d   : > { %v757_v2 = vadd.f32 %v756_v58, %v646_v1  ;;  %v850_v6 = vpop.f32.mrf.mxu0 }
 0x14f   : > { %v847_v4 = vadd.f32 %v846_v62, %v757_v2 }
 0x151   : > { %v929_v15 = vadd.f32 %v928_v54, %v847_v4  ;;  %v762_v7 = vpop.f32.mrf.mxu3 }
 0x152   : > { %v650_v5 = vpop.f32.mrf.mxu2 }
 0x153   : > { %v999_v0 = vmin.f32 %v995_v33, %v929_v15  ;;  %v651_v53 = vadd.f32 %v650_v5, %v1789_v60  ;;  %1052 = vxpose.xlu0.b32.cont [13/16] %v929_v15, 128  ;;  %v936_v35 = vpop.f32.mrf.mxu1  ;;  %v1018_v59 = vld [vmem:[%s1855_s9] sm:$0x1] }
 0x155   : > { %v763_v10 = vadd.f32 %v762_v7, %v651_v53  ;;  %v854_v24 = vpop.f32.mrf.mxu0 }
 0x157   : > { %v851_v14 = vadd.f32 %v850_v6, %v763_v10 }
 0x159   : > { %v933_v21 = vadd.f32 %v932_v29, %v851_v14  ;;  %v768_v19 = vpop.f32.mrf.mxu3 }
 0x15a   : > { %v655_v25 = vpop.f32.mrf.mxu2 }
 0x15b   : > { %v1000_v34 = vmin.f32 %v996_v26, %v933_v21  ;;  %v656_v30 = vadd.f32 %v655_v25, %v1800_v12  ;;  %1053 = vxpose.xlu0.b32.cont [14/16] %v933_v21, 128  ;;  %v940_v32 = vpop.f32.mrf.mxu1 }
 0x15d   : > { %v1003_v31 = vmin.f32 %v999_v0, %v1000_v34  ;;  %v769_v36 = vadd.f32 %v768_v19, %v656_v30  ;;  %v858_v41 = vpop.f32.mrf.mxu0 }
 0x15f   : > { %v855_v60 = vadd.f32 %v854_v24, %v769_v36 }
 0x161   : > { %v937_v40 = vadd.f32 %v936_v35, %v855_v60  ;;  %v774_v18 = vpop.f32.mrf.mxu3 }
 0x162   : > { %v660_v13 = vpop.f32.mrf.mxu2 }
 0x163   : > { %v1001_v20 = vmin.f32 %v997_v8, %v937_v40  ;;  %v661_v23 = vadd.f32 %v660_v13, %v1811_v38  ;;  %1054 = vxpose.xlu0.b32.cont [15/16] %v937_v40, 128 }
 0x165   : > { %v775_v43 = vadd.f32 %v774_v18, %v661_v23 }
 0x167   : > { %v859_v16 = vadd.f32 %v858_v41, %v775_v43 }
 0x169   : > { %v941_v22 = vadd.f32 %v940_v32, %v859_v16 }
 0x16b   : > { %v1002_v12 = vmin.f32 %v998_v61, %v941_v22  ;;  %1055 = vxpose.xlu0.b32.end [16/16] %v941_v22, 128 }
 0x16d   : > { %v1004_v33 = vmin.f32 %v1001_v20, %v1002_v12 }
 0x16f   : > { %v1005_v17 = vmin.f32 %v1003_v31, %v1004_v33 }
 0x171   : > { %v1006_v42 = vrot.slane %v1005_v17, 4 }
 0x173   : > { %v1007_v48 = vmin.f32 %v1005_v17, %v1006_v42 }
 0x175   : > { %v1008_v28 = vrot.slane %v1007_v48, 2 }
 0x177   : > { %v1009_v39 = vmin.f32 %v1007_v48, %v1008_v28 }
 0x179   : > { %v1010_v38 = vrot.slane %v1009_v39, 1 }
 0x17b   : > { %v1011_v45 = vmin.f32 %v1009_v39, %v1010_v38 }
 0x17d   : > { %v1012_v3 = vmax.f32 %v1011_v45, 0.0 }
 0x17f   : > { %v1019_v26 = vmin.f32 %v1018_v59, %v1012_v3 }
 0x181   : > { %1020 = vst [vmem:[%s1855_s9] sm:$0x1] %v1019_v26 }
 0x197   : > { %v1056_v11 = vpop.trf.xlu0 }
 0x19f   : > { %v1057_v49 = vpop.trf.xlu0 }
 0x1a7   : > { %v1058_v56 = vpop.trf.xlu0 }
 0x1a8   : > { %1346 = shalt.err (!%p1343_p5)
}
 0x1a9   : > { %1259 = dma.vmem_to_hbm [thread:$0]  (%p1492_p4), %s1126_s19, 16, %s1128_s21, %s1100_s23  }
 0x1aa   : > { %s1109_s9 = scalar_lea.hbm %s1918_s2, %s1421_s15  ;;  %s221_s10 = scalar_lea.vmem [#allocation3], %s1851_s8 }
 0x1ab   : > { %s1111_s11 = sshll.u32 %s221_s10, 4  ;;  %s1113_s18 = sshll.u32 %s1109_s9, 4  ;;  %s1112_s11 = int_to_ptr.vmem [resolvable:$true] %s1111_s11  ;;  %s1114_s18 = int_to_ptr.hbm [resolvable:$true] %s1113_s18 }
 0x1ac   : > { %s1096_s19 = scalar_lea.sflag [#allocation4], %s1851_s8  ;;  %s1361_s21 = sshra.s32 %s1114_s18, 4  ;;  %s1362_s21 = int_to_ptr.hbm [resolvable:$true] %s1361_s21 }
 0x1ad   : > { %s1363_s23 = scalar_lea.hbm %s1362_s21, 1  ;;  %s1367_s15 = scalar_lea.hbm %s1918_s2, 2 }
 0x1ae   : > { %p1364_p6 = scmp.ne.s32.totalorder %s1362_s21, %s1363_s23  ;;  %p1368_p10 = scmp.lt.s32.totalorder %s1362_s21, %s1918_s2 }
 0x1af   : > { %v1059_v27 = vpop.trf.xlu0  ;;  %p1369_p11 = scmp.lt.s32.totalorder %s1367_s15, %s1363_s23 }
 0x1b0   : > { %p1365_p7 = pnand %p1364_p6, %p1492_p4 }
 0x1b1   : > { %p1370_p12 = por %p1369_p11, %p1368_p10 }
 0x1b2   : > { %p1366_p9 = pneg %p1365_p7 }
 0x1b4   : > { %p1371_p13 = pnand %p1370_p12, %p1366_p9 }
 0x1b7   : > { %v1060_v37 = vpop.trf.xlu0 }
 0x1b8   : > { %v1072_v44 = vmin.f32 %v1056_v11, %v1060_v37 }
 0x1bf   : > { %v1061_v47 = vpop.trf.xlu0 }
 0x1c0   : > { %v1073_v50 = vmin.f32 %v1057_v49, %v1061_v47 }
 0x1c7   : > { %v1062_v8 = vpop.trf.xlu0 }
 0x1c8   : > { %v1074_v51 = vmin.f32 %v1058_v56, %v1062_v8 }
 0x1cf   : > { %v1063_v52 = vpop.trf.xlu0 }
 0x1d0   : > { %v1075_v15 = vmin.f32 %v1059_v27, %v1063_v52 }
 0x1d7   : > { %v1064_v62 = vpop.trf.xlu0 }
 0x1d8   : > { %v1076_v57 = vmin.f32 %v1072_v44, %v1064_v62 }
 0x1df   : > { %v1065_v63 = vpop.trf.xlu0 }
 0x1e0   : > { %v1077_v58 = vmin.f32 %v1073_v50, %v1065_v63 }
 0x1e7   : > { %v1066_v54 = vpop.trf.xlu0 }
 0x1e8   : > { %v1078_v29 = vmin.f32 %v1074_v51, %v1066_v54 }
 0x1ef   : > { %v1067_v55 = vpop.trf.xlu0 }
 0x1f0   : > { %v1079_v5 = vmin.f32 %v1075_v15, %v1067_v55 }
 0x1f7   : > { %v1068_v9 = vpop.trf.xlu0 }
 0x1f8   : > { %v1080_v1 = vmin.f32 %v1076_v57, %v1068_v9 }
 0x1ff   : > { %v1069_v61 = vpop.trf.xlu0 }
 0x200   : > { %v1081_v2 = vmin.f32 %v1077_v58, %v1069_v61 }
 0x202   : > { %v1084_v4 = vmin.f32 %v1080_v1, %v1081_v2 }
 0x207   : > { %v1070_v6 = vpop.trf.xlu0 }
 0x208   : > { %v1082_v0 = vmin.f32 %v1078_v29, %v1070_v6 }
 0x20f   : > { %v1071_v7 = vpop.trf.xlu0 }
 0x210   : > { %v1083_v53 = vmin.f32 %v1079_v5, %v1071_v7 }
 0x212   : > { %v1085_v10 = vmin.f32 %v1082_v0, %v1083_v53 }
 0x214   : > { %v1086_v14 = vmin.f32 %v1084_v4, %v1085_v10 }
 0x216   : > { %v1087_v46 = vrot.slane %v1086_v14, 4 }
 0x218   : > { %v1088_v21 = vmin.f32 %v1086_v14, %v1087_v46 }
 0x21a   : > { %v1089_v24 = vrot.slane %v1088_v21, 2 }
 0x21c   : > { %v1090_v25 = vmin.f32 %v1088_v21, %v1089_v24 }
 0x21e   : > { %v1091_v19 = vrot.slane %v1090_v25, 1 }
 0x220   : > { %v1092_v34 = vmin.f32 %v1090_v25, %v1091_v19 }
 0x222   : > { %v1093_v30 = vmax.f32 %v1092_v34, 0.0 }
 0x224   : > { %1094 = vst [vmem:[%s221_s10] sm:$0x1] %v1093_v30 }
 0x225   : > { %1374 = shalt.err (!%p1371_p13)
}
 0x226   : > { %1258 = dma.vmem_to_hbm [thread:$0]  (%p1492_p4), %s1112_s11, 16, %s1114_s18, %s1096_s19  }
 0x227 PF: > { %p1269_p0 = scmp.ge.s32.totalorder %s1429_s17, 2  ;;  %s1139_s8 = sand.u32 1, %s1409_s12  }
 0x228   : > { %s1140_s30 = scalar_lea.sflag [#allocation4], %s1139_s8 }
 0x229   : > { %p1263_p1 = pnand %p1269_p0, %p1499_p8 }
 0x22b   : > { %p1264_p2 = pneg %p1263_p1 }
 0x22d   : > { %1400 = dma.done.wait (%p1264_p2), %s1140_s30, 16  }
 0x22e   : > { %1402 = vsyncadd (%p1264_p2), %s1140_s30, 4294967280  ;;  %s1149_s4 = scalar_lea.sflag [#allocation6], %s1139_s8 }
 0x22f   : > { %1404 = dma.done.wait (%p1264_p2), %s1149_s4, 16  }
 0x230   : > { %1406 = vsyncadd (%p1264_p2), %s1149_s4, 4294967280  ;;  %s20_s17 = sadd.s32 1, %s1429_s17   ;;  %s1922_s12 = smov %s1413_s13 }
 0x231   : > { %p17_p3 = scmp.ge.s32.totalorder %s20_s17, 4   ;;  %s1923_s13 = smov %s1417_s14 }
 0x232   : > { %s1924_s14 = smov %s1505_s25  ;;  %s1925_s15 = smov %s1425_s16 }
 0x233   : > { %s1926_s16 = smov %s1928_s20  ;;  %19 = sbr.rel (!%p17_p3) target bundleno = 6 (0x6), region = 92 }
 0x238   :  { %1154 = vsyncpa [#allocation4], 1 }
 0x239   :  { %1156 = vsyncpa [#allocation4 + $0x1], 1 }
 0x23a   :  { %1157 = vsyncpa [#allocation6], 1 }
 0x23b   :  { %1159 = vsyncpa [#allocation6 + $0x1], 1 }

</bundles_post_ra>
